<compile_context>
chip_gen: v7x
topology: tpu7x:2x2x1
jax: 0.10.0
libtpu: 0.0.40
codegen_flags: <defaults>
</compile_context>

<pallas_src>
import math
import numpy as np

import jax
import jax.numpy as jnp
from jax.experimental import pallas as pl
from jax.experimental.pallas import tpu as pltpu

MXU_DTYPE = jnp.bfloat16     # MXU operands + staging slabs (bf16-native on v5e/v6e/v7x)
ACT_DTYPE = jnp.bfloat16     # inter-block activations in HBM (final output stays f32)
LANE = 128


def _round_up(x, m):
    return (x + m - 1) // m * m


def _geom(H, W, stride):
    """Output-grid geometry of a block: (Ho, Wo, Hgo, Wgo, PGo, E, PGo_pad)."""
    Ho, Wo = H // stride, W // stride
    Hgo, Wgo = Ho + 1, Wo + 1            # one extra (masked) row/col -> conv zero pad
    PGo = Hgo * Wgo                      # flat grid length
    E = Wgo + 1                          # max |tap shift| on the flat grid
    # per-image lane padding: multiple of 128 AND >= E spare lanes so that a
    # negative tap shift from image g only ever reads image (g-1)'s zero pad.
    PGo_pad = _round_up(PGo + E, LANE)
    return Ho, Wo, Hgo, Wgo, PGo, E, PGo_pad


def _choose_group(N, pg_pad, lane_target=512):
    """Images per grid step: keep the MXU streaming >= ~lane_target lanes while
    preferring >= 2 grid steps (v7x has 2 TensorCores) when the batch allows."""
    cap = max(1, lane_target // pg_pad)
    best = 1
    for g in range(1, N + 1):
        if N % g != 0 or g > cap:
            continue
        if N // g >= 2 or g * pg_pad >= 256 or g == N:
            best = g
    return best


# ------------------------------------------------------------------ fused BasicBlock kernel

def _make_block_kernel(*, Cin, Cout, Wgo, stride, equal, width, E_slab):
    """One grid step == G lane-concatenated images (width = G * PGo_pad lanes)."""
    assert not (equal and stride != 1)
    f32 = jnp.float32
    bt = MXU_DTYPE

    if stride == 1:
        # tap t = 3*kh+kw, flat shift on the (single) input grid
        taps1 = [(3 * kh + kw, (kh - 1) * Wgo + (kw - 1))
                 for kh in range(3) for kw in range(3)]
    else:
        # stride-2: tap -> (phase, non-negative flat shift) on the phase grids
        taps1 = [(3 * kh + kw, 2 * (kh % 2) + (kw % 2), (kh // 2) * Wgo + (kw // 2))
                 for kh in range(3) for kw in range(3)]
    taps2 = [(3 * kh + kw, (kh - 1) * Wgo + (kw - 1))
             for kh in range(3) for kw in range(3)]

    def kernel(x_ref, m_ref, s1_ref, b1_ref, w1_ref, s2_ref, b2_ref, w2_ref,
               o_ref, a_ext, stk1, mid_ext, stk2):
        s1 = s1_ref[...]
        b1 = b1_ref[...]
        z_in = jnp.zeros((Cin, E_slab), bt)
        z_out = jnp.zeros((Cout, E_slab), bt)

        # ---------- BN1 + ReLU + spatial/pad mask (f32 VPU), staged ONCE as bf16 ----------
        xv = None
        if stride == 1:
            xv = x_ref[...]
            a = jnp.maximum(xv * s1 + b1, 0.0) * m_ref[0:1, :]
            a_ext[:, :E_slab] = z_in                              # front zero extension
            a_ext[:, E_slab + width:] = z_in                      # back zero extension
            a_ext[:, E_slab:E_slab + width] = a.astype(bt)        # lane-aligned big store
        else:
            for ph in range(4):                                   # 4 stride-2 phases
                a_ph = jnp.maximum(x_ref[ph] * s1 + b1, 0.0) * m_ref[ph:ph + 1, :]
                a_ext[ph, :, :width] = a_ph.astype(bt)
                a_ext[ph, :, width:] = z_in                       # tail zero extension

        # ---------- conv1 (3x3, stride) as ONE K=9*Cin MXU matmul ----------
        # (the 1x1 shortcut of non-equal blocks is folded into extra weight rows
        #  hitting only the centre-tap columns -> rows [Cout:2Cout] of the result)
        for tap in taps1:
            if stride == 1:
                t, s = tap
                stk1[t * Cin:(t + 1) * Cin, :] = a_ext[:, E_slab + s:E_slab + s + width]
            else:
                t, ph, s = tap
                stk1[t * Cin:(t + 1) * Cin, :] = a_ext[ph, :, s:s + width]
        acc = jnp.dot(w1_ref[...], stk1[...], preferred_element_type=f32)
        if equal:
            acc1 = acc
            res = xv.astype(f32)            # identity residual (pre-BN input)
        else:
            acc1 = acc[:Cout, :]
            res = acc[Cout:, :]             # folded 1x1 shortcut residual

        # ---------- BN2 + ReLU + output-grid mask ----------
        mo = m_ref[0:1, :] if stride == 1 else m_ref[4:5, :]
        mid = jnp.maximum(acc1 * s2_ref[...] + b2_ref[...], 0.0) * mo
        # TODO(synk): F.dropout path not implemented (dropRate=0.0 / use_dropout=False).
        mid_ext[:, :E_slab] = z_out
        mid_ext[:, E_slab + width:] = z_out
        mid_ext[:, E_slab:E_slab + width] = mid.astype(bt)

        # ---------- conv2 (3x3, stride 1) as ONE K=9*Cout MXU matmul ----------
        for t, s in taps2:
            stk2[t * Cout:(t + 1) * Cout, :] = mid_ext[:, E_slab + s:E_slab + s + width]
        acc2 = jnp.dot(w2_ref[...], stk2[...], preferred_element_type=f32)

        # ---------- residual add, store (bf16 for chained blocks, f32 for the last) ----------
        o_ref[...] = (acc2 + res).astype(o_ref.dtype)

    if stride == 1:
        a_ext_shape = (Cin, 2 * E_slab + width)
    else:
        a_ext_shape = (4, Cin, width + E_slab)
    scratch = [pltpu.VMEM(a_ext_shape, bt),              # BN1+ReLU slab(s), zero-extended
               pltpu.VMEM((9 * Cin, width), bt),         # stacked conv1 operand
               pltpu.VMEM((Cout, 2 * E_slab + width), bt),
               pltpu.VMEM((9 * Cout, width), bt)]        # stacked conv2 operand
    return kernel, scratch


# ------------------------------------------------------------------ JAX-side layout glue

def _pack_grid_nchw(x, pg_pad):
    """(N,C,H,W) -> (C, N*pg_pad): per-image flat (H+1)x(W+1) grid (zero extra
    row/col), lanes zero-padded to pg_pad, images lane-concatenated."""
    N, C, H, W = x.shape
    Hg, Wg = H + 1, W + 1
    xg = jnp.pad(x, ((0, 0), (0, 0), (0, 1), (0, 1))).reshape(N, C, Hg * Wg)
    xg = jnp.pad(xg, ((0, 0), (0, 0), (0, pg_pad - Hg * Wg)))
    return jnp.transpose(xg, (1, 0, 2)).reshape(C, N * pg_pad)


def _pack_phases_nchw(x, pg_pad):
    """(N,C,H,W) -> (4, C, N*pg_pad): stride-2 phase decomposition of the pad-1 input."""
    N, C, H, W = x.shape
    Ho, Wo = H // 2, W // 2
    Hgo, Wgo = Ho + 1, Wo + 1
    xp = jnp.pad(x, ((0, 0), (0, 0), (1, 1), (1, 1)))
    phs = []
    for r in range(2):
        for c in range(2):
            ph = xp[:, :, r::2, c::2].reshape(N, C, Hgo * Wgo)
            ph = jnp.pad(ph, ((0, 0), (0, 0), (0, pg_pad - Hgo * Wgo)))
            phs.append(jnp.transpose(ph, (1, 0, 2)).reshape(C, N * pg_pad))
    return jnp.stack(phs, axis=0)


def _unpack_to_nchw(y, N, Ho, Wo, pg_pad):
    C = y.shape[0]
    Hgo, Wgo = Ho + 1, Wo + 1
    y = y.reshape(C, N, pg_pad)[:, :, :Hgo * Wgo].reshape(C, N, Hgo, Wgo)
    return jnp.transpose(y[:, :, :Ho, :Wo], (1, 0, 2, 3)).astype(jnp.float32)


def _make_masks(H, W, stride, G, pg_pad):
    """Static 0/1 masks: valid spatial positions = 1; extra grid row/col and the
    per-image lane padding = 0 (they implement / protect the conv zero padding)."""
    Ho, Wo = H // stride, W // stride
    Hgo, Wgo = Ho + 1, Wo + 1
    PGo = Hgo * Wgo
    if stride == 1:
        m = np.zeros((Hgo, Wgo), np.float32)
        m[:Ho, :Wo] = 1.0
        rows = [m.reshape(-1)]
    else:
        u = np.arange(Hgo)[:, None]
        v = np.arange(Wgo)[None, :]
        rows = []
        for r in range(2):
            for c in range(2):
                pr, pc = 2 * u + r, 2 * v + c
                rows.append(((pr >= 1) & (pr <= H) & (pc >= 1) & (pc <= W))
                            .astype(np.float32).reshape(-1))
        mo = np.zeros((Hgo, Wgo), np.float32)
        mo[:Ho, :Wo] = 1.0
        rows.append(mo.reshape(-1))
    m = np.stack(rows, axis=0)                         # (R, PGo)
    m = np.pad(m, ((0, 0), (0, pg_pad - PGo)))         # zero the pad lanes
    m = np.tile(m, (1, G))                             # per-image periodic over the group
    return jnp.asarray(m)


def _bn_scale_shift(gamma, beta, mean, var, eps=1e-5):
    scale = gamma / jnp.sqrt(var + eps)
    return scale, beta - mean * scale


# ------------------------------------------------------------------ module forward

def basic_block_apply(x, p, *, x_is_packed, N, H, W, G, out_dtype):
    stride, Cin, Cout = p["stride"], p["in_planes"], p["out_planes"]
    equal = Cin == Cout
    assert not (equal and stride != 1), \
        "identity residual with stride>1 is unsupported (same as the torch WRN)"
    Ho, Wo, Hgo, Wgo, PGo, E, PGo_pad = _geom(H, W, stride)
    E_slab = _round_up(E, LANE)             # lane-aligned slab extensions
    width = G * PGo_pad                     # lanes per grid step (multiple of 128)

    s1, b1 = _bn_scale_shift(p["bn1_g"], p["bn1_b"], p["bn1_m"], p["bn1_v"])
    s2, b2 = _bn_scale_shift(p["bn2_g"], p["bn2_b"], p["bn2_m"], p["bn2_v"])
    s1 = s1.reshape(Cin, 1)
    b1 = b1.reshape(Cin, 1)
    s2 = s2.reshape(Cout, 1)
    b2 = b2.reshape(Cout, 1)
    masks = _make_masks(H, W, stride, G, PGo_pad)

    if stride == 1:
        xin = x if x_is_packed else _pack_grid_nchw(x, PGo_pad)
        x_spec = pl.BlockSpec((Cin, width), lambda n: (0, n))
    else:
        assert not x_is_packed, "stride-2 blocks must come first in a NetworkBlock"
        xin = _pack_phases_nchw(x, PGo_pad)
        x_spec = pl.BlockSpec((4, Cin, width), lambda n: (0, 0, n))

    w1 = p["conv1_wp"] if equal else p["conv1s_wp"]
    kernel, scratch = _make_block_kernel(Cin=Cin, Cout=Cout, Wgo=Wgo, stride=stride,
                                         equal=equal, width=width, E_slab=E_slab)

    out = pl.pallas_call(
        kernel,
        out_shape=jax.ShapeDtypeStruct((Cout, N * PGo_pad), out_dtype),
        grid=(N // G,),
        in_specs=[
            x_spec,
            pl.BlockSpec(masks.shape, lambda n: (0, 0)),
            pl.BlockSpec((Cin, 1), lambda n: (0, 0)),
            pl.BlockSpec((Cin, 1), lambda n: (0, 0)),
            pl.BlockSpec(w1.shape, lambda n: (0, 0)),
            pl.BlockSpec((Cout, 1), lambda n: (0, 0)),
            pl.BlockSpec((Cout, 1), lambda n: (0, 0)),
            pl.BlockSpec(p["conv2_wp"].shape, lambda n: (0, 0)),
        ],
        out_specs=pl.BlockSpec((Cout, width), lambda n: (0, n)),
        scratch_shapes=scratch,
        compiler_params=pltpu.CompilerParams(
            dimension_semantics=("parallel",),          # batch-group parallel (v7x 2 TCs)
            vmem_limit_bytes=48 * 1024 * 1024),         # fits v7x's 64 MiB physical VMEM
    )(xin, masks, s1, b1, w1, s2, b2, p["conv2_wp"])
    return out, Ho, Wo, PGo_pad


def network_block_forward(x_nchw, params_list):
    N, _, H, W = x_nchw.shape
    # all blocks inside a NetworkBlock share the (downsampled) output-grid geometry
    *_, pg_pad0 = _geom(H, W, params_list[0]["stride"])
    G = _choose_group(N, pg_pad0)

    h, packed = x_nchw, False
    Hc, Wc, pad = H, W, pg_pad0
    for i, p in enumerate(params_list):
        out_dtype = jnp.float32 if i == len(params_list) - 1 else ACT_DTYPE
        h, Hc, Wc, pad = basic_block_apply(h, p, x_is_packed=packed, N=N,
                                           H=Hc, W=Wc, G=G, out_dtype=out_dtype)
        packed = True                       # chained blocks stay in the packed lane layout
    return _unpack_to_nchw(h, N, Hc, Wc, pad)


# ------------------------------------------------------------------ init (weights prepacked)

def _conv_init(key, cout, cin, k):
    n = k * k * cout
    return jax.random.normal(key, (cout, cin, k, k), jnp.float32) * math.sqrt(2.0 / n)


def _pack_conv3x3(w):
    """(Cout,Cin,3,3) -> (Cout, 9*Cin), columns tap-major (t = 3*kh + kw)."""
    co, ci = w.shape[0], w.shape[1]
    return jnp.transpose(w, (0, 2, 3, 1)).reshape(co, 9 * ci)


def _pack_conv1_with_shortcut(w1, ws):
    """Fold the 1x1 shortcut into conv1's stacked weights: rows [Cout:2Cout] hit
    only the centre-tap (t=4) columns, which carry the unshifted BN1 activation."""
    co, ci = w1.shape[0], w1.shape[1]
    top = _pack_conv3x3(w1)
    bot = jnp.zeros((co, 9, ci), w1.dtype).at[:, 4, :].set(ws.reshape(co, ci))
    return jnp.concatenate([top, bot.reshape(co, 9 * ci)], axis=0)


def init_basic_block(key, in_planes, out_planes, stride):
    ks = jax.random.split(key, 11)
    p = {"stride": stride, "in_planes": in_planes, "out_planes": out_planes}
    p["bn1_g"] = 1.0 + 0.1 * jax.random.normal(ks[0], (in_planes,), jnp.float32)
    p["bn1_b"] = 0.1 * jax.random.normal(ks[1], (in_planes,), jnp.float32)
    p["bn1_m"] = 0.1 * jax.random.normal(ks[2], (in_planes,), jnp.float32)
    p["bn1_v"] = 1.0 + 0.1 * jnp.abs(jax.random.normal(ks[3], (in_planes,), jnp.float32))
    w1 = _conv_init(ks[4], out_planes, in_planes, 3)
    p["bn2_g"] = 1.0 + 0.1 * jax.random.normal(ks[5], (out_planes,), jnp.float32)
    p["bn2_b"] = 0.1 * jax.random.normal(ks[6], (out_planes,), jnp.float32)
    p["bn2_m"] = 0.1 * jax.random.normal(ks[7], (out_planes,), jnp.float32)
    p["bn2_v"] = 1.0 + 0.1 * jnp.abs(jax.random.normal(ks[8], (out_planes,), jnp.float32))
    w2 = _conv_init(ks[9], out_planes, out_planes, 3)
    p["conv1_w"], p["conv2_w"] = w1, w2                          # OIHW (reference)
    p["conv2_wp"] = _pack_conv3x3(w2).astype(MXU_DTYPE)
    if in_planes == out_planes:
        p["conv1_wp"] = _pack_conv3x3(w1).astype(MXU_DTYPE)
    else:
        ws = _conv_init(ks[10], out_planes, in_planes, 1)
        p["short_w"] = ws
        p["conv1s_wp"] = _pack_conv1_with_shortcut(w1, ws).astype(MXU_DTYPE)
    return p


def init_network_block(key, nb_layers, in_planes, out_planes, stride):
    keys = jax.random.split(key, nb_layers)
    params = []
    for i in range(nb_layers):
        ip = in_planes if i == 0 else out_planes
        st = stride if i == 0 else 1
        params.append(init_basic_block(keys[i], ip, out_planes, st))
    return params


# ------------------------------------------------------------------ pure-JAX reference

def _conv_ref(x, w_oihw, stride, pad):
    return jax.lax.conv_general_dilated(
        x, w_oihw, (stride, stride), [(pad, pad), (pad, pad)],
        dimension_numbers=("NCHW", "OIHW", "NCHW"))


def _ref_block(x, p):
    equal = p["in_planes"] == p["out_planes"]
    s1, b1 = _bn_scale_shift(p["bn1_g"], p["bn1_b"], p["bn1_m"], p["bn1_v"])
    a = jnp.maximum(x * s1[None, :, None, None] + b1[None, :, None, None], 0.0)
    out = _conv_ref(a, p["conv1_w"], p["stride"], 1)
    s2, b2 = _bn_scale_shift(p["bn2_g"], p["bn2_b"], p["bn2_m"], p["bn2_v"])
    out = jnp.maximum(out * s2[None, :, None, None] + b2[None, :, None, None], 0.0)
    out = _conv_ref(out, p["conv2_w"], 1, 1)
    res = x if equal else _conv_ref(a, p["short_w"], p["stride"], 0)
    return res + out


def _ref_forward(x_nchw, params_list):
    x = x_nchw
    for p in params_list:
        x = _ref_block(x, p)
    return x


# ------------------------------------------------------------------ main

if __name__ == "__main__":
    key = jax.random.PRNGKey(0)
    kx, kp = jax.random.split(key)

    # NetworkBlock(nb_layers=2, in_planes=4, out_planes=8, block=BasicBlock,
    #              stride=2, dropRate=0.0, use_dropout=False)
    nb_layers, in_planes, out_planes, stride = 2, 4, 8, 2
    x = jax.random.normal(kx, (2, in_planes, 16, 16), jnp.float32)   # NCHW like PyTorch

    params = init_network_block(kp, nb_layers, in_planes, out_planes, stride)

    y = jax.block_until_ready(network_block_forward(x, params))
    y_ref = jax.block_until_ready(_ref_forward(x, params))

    assert y.shape == (2, out_planes, 8, 8), y.shape
    err = float(jnp.max(jnp.abs(y - y_ref)))
    scale = float(jnp.max(jnp.abs(y_ref)))
    # bf16 MXU operands + bf16 inter-block activations -> ~1e-2-level drift vs f32 ref
    assert err <= 5e-2 * max(1.0, scale), (err, scale)

    print("KERNEL_OK")
</pallas_src>

<mosaic_0001>
module attributes {stable_mosaic.version = 11 : i64} {
  func.func @kernel(%arg0: i32, %arg1: memref<4x4x256xf32, #tpu.memory_space<vmem>>, %arg2: memref<5x256xf32, #tpu.memory_space<vmem>>, %arg3: memref<4x1xf32, #tpu.memory_space<vmem>>, %arg4: memref<4x1xf32, #tpu.memory_space<vmem>>, %arg5: memref<16x36xbf16, #tpu.memory_space<vmem>>, %arg6: memref<8x1xf32, #tpu.memory_space<vmem>>, %arg7: memref<8x1xf32, #tpu.memory_space<vmem>>, %arg8: memref<8x72xbf16, #tpu.memory_space<vmem>>, %arg9: memref<8x256xbf16, #tpu.memory_space<vmem>>, %arg10: memref<4x4x384xbf16, #tpu.memory_space<vmem>>, %arg11: memref<36x256xbf16, #tpu.memory_space<vmem>>, %arg12: memref<8x512xbf16, #tpu.memory_space<vmem>>, %arg13: memref<72x256xbf16, #tpu.memory_space<vmem>>) attributes {dimension_semantics = [#tpu.dimension_semantics<parallel>], iteration_bounds = array<i64: 1>, scalar_prefetch = 0 : i64, scratch_operands = 4 : i64, tpu.core_type = #tpu.core_type<tc>, window_params = [{transform_indices = @transform_0, window_bounds = array<i64: 4, 4, 256>}, {pipeline_mode = #tpu.pipeline_mode<synchronous>, transform_indices = @transform_1, window_bounds = array<i64: 5, 256>}, {pipeline_mode = #tpu.pipeline_mode<synchronous>, transform_indices = @transform_2, window_bounds = array<i64: 4, 1>}, {pipeline_mode = #tpu.pipeline_mode<synchronous>, transform_indices = @transform_3, window_bounds = array<i64: 4, 1>}, {pipeline_mode = #tpu.pipeline_mode<synchronous>, transform_indices = @transform_4, window_bounds = array<i64: 16, 36>}, {pipeline_mode = #tpu.pipeline_mode<synchronous>, transform_indices = @transform_5, window_bounds = array<i64: 8, 1>}, {pipeline_mode = #tpu.pipeline_mode<synchronous>, transform_indices = @transform_6, window_bounds = array<i64: 8, 1>}, {pipeline_mode = #tpu.pipeline_mode<synchronous>, transform_indices = @transform_7, window_bounds = array<i64: 8, 72>}, {transform_indices = @transform_8, window_bounds = array<i64: 8, 256>}]} {
    %c0 = arith.constant 0 : index
    %c0_0 = arith.constant 0 : index
    %0 = vector.load %arg3[%c0, %c0_0] : memref<4x1xf32, #tpu.memory_space<vmem>>, vector<4x1xf32>
    %c0_1 = arith.constant 0 : index
    %c0_2 = arith.constant 0 : index
    %1 = vector.load %arg4[%c0_1, %c0_2] : memref<4x1xf32, #tpu.memory_space<vmem>>, vector<4x1xf32>
    %cst = arith.constant 0.000000e+00 : bf16
    %2 = vector.broadcast %cst : bf16 to vector<4x128xbf16>
    %cst_3 = arith.constant 0.000000e+00 : bf16
    %3 = vector.broadcast %cst_3 : bf16 to vector<8x128xbf16>
    %c0_4 = arith.constant 0 : index
    %c0_5 = arith.constant 0 : index
    %c0_6 = arith.constant 0 : index
    %4 = vector.load %arg1[%c0_4, %c0_5, %c0_6] : memref<4x4x256xf32, #tpu.memory_space<vmem>>, vector<1x4x256xf32>
    %5 = vector.shape_cast %4 : vector<1x4x256xf32> to vector<4x256xf32>
    %6 = vector.broadcast %0 : vector<4x1xf32> to vector<4x256xf32>
    %7 = arith.mulf %5, %6 : vector<4x256xf32>
    %8 = vector.broadcast %1 : vector<4x1xf32> to vector<4x256xf32>
    %9 = arith.addf %7, %8 : vector<4x256xf32>
    %cst_7 = arith.constant 0.000000e+00 : f32
    %10 = vector.broadcast %cst_7 : f32 to vector<4x256xf32>
    %11 = arith.maximumf %9, %10 : vector<4x256xf32>
    %c0_8 = arith.constant 0 : index
    %c0_9 = arith.constant 0 : index
    %12 = vector.load %arg2[%c0_8, %c0_9] : memref<5x256xf32, #tpu.memory_space<vmem>>, vector<1x256xf32>
    %13 = vector.broadcast %12 : vector<1x256xf32> to vector<4x256xf32>
    %14 = arith.mulf %11, %13 : vector<4x256xf32>
    %15 = arith.truncf %14 : vector<4x256xf32> to vector<4x256xbf16>
    %c0_10 = arith.constant 0 : index
    %c0_11 = arith.constant 0 : index
    %c0_12 = arith.constant 0 : index
    %16 = vector.load %arg10[%c0_10, %c0_11, %c0_12] : memref<4x4x384xbf16, #tpu.memory_space<vmem>>, vector<1x4x256xbf16>
    %17 = vector.shape_cast %16 : vector<1x4x256xbf16> to vector<4x256xbf16>
    %18 = vector.shape_cast %15 : vector<4x256xbf16> to vector<1x4x256xbf16>
    tpu.vector_store %arg10[%c0_10, %c0_11, %c0_12], %18 {strides = array<i32>} : memref<4x4x384xbf16, #tpu.memory_space<vmem>>, vector<1x4x256xbf16>,
    %c0_13 = arith.constant 0 : index
    %c0_14 = arith.constant 0 : index
    %c256 = arith.constant 256 : index
    %19 = vector.load %arg10[%c0_13, %c0_14, %c256] : memref<4x4x384xbf16, #tpu.memory_space<vmem>>, vector<1x4x128xbf16>
    %20 = vector.shape_cast %19 : vector<1x4x128xbf16> to vector<4x128xbf16>
    %21 = vector.shape_cast %2 : vector<4x128xbf16> to vector<1x4x128xbf16>
    tpu.vector_store %arg10[%c0_13, %c0_14, %c256], %21 {strides = array<i32>} : memref<4x4x384xbf16, #tpu.memory_space<vmem>>, vector<1x4x128xbf16>,
    %c1 = arith.constant 1 : index
    %c0_15 = arith.constant 0 : index
    %c0_16 = arith.constant 0 : index
    %22 = vector.load %arg1[%c1, %c0_15, %c0_16] : memref<4x4x256xf32, #tpu.memory_space<vmem>>, vector<1x4x256xf32>
    %23 = vector.shape_cast %22 : vector<1x4x256xf32> to vector<4x256xf32>
    %24 = vector.broadcast %0 : vector<4x1xf32> to vector<4x256xf32>
    %25 = arith.mulf %23, %24 : vector<4x256xf32>
    %26 = vector.broadcast %1 : vector<4x1xf32> to vector<4x256xf32>
    %27 = arith.addf %25, %26 : vector<4x256xf32>
    %cst_17 = arith.constant 0.000000e+00 : f32
    %28 = vector.broadcast %cst_17 : f32 to vector<4x256xf32>
    %29 = arith.maximumf %27, %28 : vector<4x256xf32>
    %c1_18 = arith.constant 1 : index
    %c0_19 = arith.constant 0 : index
    %30 = vector.load %arg2[%c1_18, %c0_19] : memref<5x256xf32, #tpu.memory_space<vmem>>, vector<1x256xf32>
    %31 = vector.broadcast %30 : vector<1x256xf32> to vector<4x256xf32>
    %32 = arith.mulf %29, %31 : vector<4x256xf32>
    %33 = arith.truncf %32 : vector<4x256xf32> to vector<4x256xbf16>
    %c1_20 = arith.constant 1 : index
    %c0_21 = arith.constant 0 : index
    %c0_22 = arith.constant 0 : index
    %34 = vector.load %arg10[%c1_20, %c0_21, %c0_22] : memref<4x4x384xbf16, #tpu.memory_space<vmem>>, vector<1x4x256xbf16>
    %35 = vector.shape_cast %34 : vector<1x4x256xbf16> to vector<4x256xbf16>
    %36 = vector.shape_cast %33 : vector<4x256xbf16> to vector<1x4x256xbf16>
    tpu.vector_store %arg10[%c1_20, %c0_21, %c0_22], %36 {strides = array<i32>} : memref<4x4x384xbf16, #tpu.memory_space<vmem>>, vector<1x4x256xbf16>,
    %c1_23 = arith.constant 1 : index
    %c0_24 = arith.constant 0 : index
    %c256_25 = arith.constant 256 : index
    %37 = vector.load %arg10[%c1_23, %c0_24, %c256_25] : memref<4x4x384xbf16, #tpu.memory_space<vmem>>, vector<1x4x128xbf16>
    %38 = vector.shape_cast %37 : vector<1x4x128xbf16> to vector<4x128xbf16>
    %39 = vector.shape_cast %2 : vector<4x128xbf16> to vector<1x4x128xbf16>
    tpu.vector_store %arg10[%c1_23, %c0_24, %c256_25], %39 {strides = array<i32>} : memref<4x4x384xbf16, #tpu.memory_space<vmem>>, vector<1x4x128xbf16>,
    %c2 = arith.constant 2 : index
    %c0_26 = arith.constant 0 : index
    %c0_27 = arith.constant 0 : index
    %40 = vector.load %arg1[%c2, %c0_26, %c0_27] : memref<4x4x256xf32, #tpu.memory_space<vmem>>, vector<1x4x256xf32>
    %41 = vector.shape_cast %40 : vector<1x4x256xf32> to vector<4x256xf32>
    %42 = vector.broadcast %0 : vector<4x1xf32> to vector<4x256xf32>
    %43 = arith.mulf %41, %42 : vector<4x256xf32>
    %44 = vector.broadcast %1 : vector<4x1xf32> to vector<4x256xf32>
    %45 = arith.addf %43, %44 : vector<4x256xf32>
    %cst_28 = arith.constant 0.000000e+00 : f32
    %46 = vector.broadcast %cst_28 : f32 to vector<4x256xf32>
    %47 = arith.maximumf %45, %46 : vector<4x256xf32>
    %c2_29 = arith.constant 2 : index
    %c0_30 = arith.constant 0 : index
    %48 = vector.load %arg2[%c2_29, %c0_30] : memref<5x256xf32, #tpu.memory_space<vmem>>, vector<1x256xf32>
    %49 = vector.broadcast %48 : vector<1x256xf32> to vector<4x256xf32>
    %50 = arith.mulf %47, %49 : vector<4x256xf32>
    %51 = arith.truncf %50 : vector<4x256xf32> to vector<4x256xbf16>
    %c2_31 = arith.constant 2 : index
    %c0_32 = arith.constant 0 : index
    %c0_33 = arith.constant 0 : index
    %52 = vector.load %arg10[%c2_31, %c0_32, %c0_33] : memref<4x4x384xbf16, #tpu.memory_space<vmem>>, vector<1x4x256xbf16>
    %53 = vector.shape_cast %52 : vector<1x4x256xbf16> to vector<4x256xbf16>
    %54 = vector.shape_cast %51 : vector<4x256xbf16> to vector<1x4x256xbf16>
    tpu.vector_store %arg10[%c2_31, %c0_32, %c0_33], %54 {strides = array<i32>} : memref<4x4x384xbf16, #tpu.memory_space<vmem>>, vector<1x4x256xbf16>,
    %c2_34 = arith.constant 2 : index
    %c0_35 = arith.constant 0 : index
    %c256_36 = arith.constant 256 : index
    %55 = vector.load %arg10[%c2_34, %c0_35, %c256_36] : memref<4x4x384xbf16, #tpu.memory_space<vmem>>, vector<1x4x128xbf16>
    %56 = vector.shape_cast %55 : vector<1x4x128xbf16> to vector<4x128xbf16>
    %57 = vector.shape_cast %2 : vector<4x128xbf16> to vector<1x4x128xbf16>
    tpu.vector_store %arg10[%c2_34, %c0_35, %c256_36], %57 {strides = array<i32>} : memref<4x4x384xbf16, #tpu.memory_space<vmem>>, vector<1x4x128xbf16>,
    %c3 = arith.constant 3 : index
    %c0_37 = arith.constant 0 : index
    %c0_38 = arith.constant 0 : index
    %58 = vector.load %arg1[%c3, %c0_37, %c0_38] : memref<4x4x256xf32, #tpu.memory_space<vmem>>, vector<1x4x256xf32>
    %59 = vector.shape_cast %58 : vector<1x4x256xf32> to vector<4x256xf32>
    %60 = vector.broadcast %0 : vector<4x1xf32> to vector<4x256xf32>
    %61 = arith.mulf %59, %60 : vector<4x256xf32>
    %62 = vector.broadcast %1 : vector<4x1xf32> to vector<4x256xf32>
    %63 = arith.addf %61, %62 : vector<4x256xf32>
    %cst_39 = arith.constant 0.000000e+00 : f32
    %64 = vector.broadcast %cst_39 : f32 to vector<4x256xf32>
    %65 = arith.maximumf %63, %64 : vector<4x256xf32>
    %c3_40 = arith.constant 3 : index
    %c0_41 = arith.constant 0 : index
    %66 = vector.load %arg2[%c3_40, %c0_41] : memref<5x256xf32, #tpu.memory_space<vmem>>, vector<1x256xf32>
    %67 = vector.broadcast %66 : vector<1x256xf32> to vector<4x256xf32>
    %68 = arith.mulf %65, %67 : vector<4x256xf32>
    %69 = arith.truncf %68 : vector<4x256xf32> to vector<4x256xbf16>
    %c3_42 = arith.constant 3 : index
    %c0_43 = arith.constant 0 : index
    %c0_44 = arith.constant 0 : index
    %70 = vector.load %arg10[%c3_42, %c0_43, %c0_44] : memref<4x4x384xbf16, #tpu.memory_space<vmem>>, vector<1x4x256xbf16>
    %71 = vector.shape_cast %70 : vector<1x4x256xbf16> to vector<4x256xbf16>
    %72 = vector.shape_cast %69 : vector<4x256xbf16> to vector<1x4x256xbf16>
    tpu.vector_store %arg10[%c3_42, %c0_43, %c0_44], %72 {strides = array<i32>} : memref<4x4x384xbf16, #tpu.memory_space<vmem>>, vector<1x4x256xbf16>,
    %c3_45 = arith.constant 3 : index
    %c0_46 = arith.constant 0 : index
    %c256_47 = arith.constant 256 : index
    %73 = vector.load %arg10[%c3_45, %c0_46, %c256_47] : memref<4x4x384xbf16, #tpu.memory_space<vmem>>, vector<1x4x128xbf16>
    %74 = vector.shape_cast %73 : vector<1x4x128xbf16> to vector<4x128xbf16>
    %75 = vector.shape_cast %2 : vector<4x128xbf16> to vector<1x4x128xbf16>
    tpu.vector_store %arg10[%c3_45, %c0_46, %c256_47], %75 {strides = array<i32>} : memref<4x4x384xbf16, #tpu.memory_space<vmem>>, vector<1x4x128xbf16>,
    %c0_48 = arith.constant 0 : index
    %c0_49 = arith.constant 0 : index
    %c0_50 = arith.constant 0 : index
    %76 = vector.load %arg10[%c0_48, %c0_49, %c0_50] : memref<4x4x384xbf16, #tpu.memory_space<vmem>>, vector<1x4x256xbf16>
    %77 = vector.shape_cast %76 : vector<1x4x256xbf16> to vector<4x256xbf16>
    %c0_51 = arith.constant 0 : index
    %c0_52 = arith.constant 0 : index
    %78 = vector.load %arg11[%c0_51, %c0_52] : memref<36x256xbf16, #tpu.memory_space<vmem>>, vector<4x256xbf16>
    tpu.vector_store %arg11[%c0_51, %c0_52], %77 {strides = array<i32>} : memref<36x256xbf16, #tpu.memory_space<vmem>>, vector<4x256xbf16>,
    %c1_53 = arith.constant 1 : index
    %c0_54 = arith.constant 0 : index
    %c0_55 = arith.constant 0 : index
    %79 = vector.load %arg10[%c1_53, %c0_54, %c0_55] : memref<4x4x384xbf16, #tpu.memory_space<vmem>>, vector<1x4x256xbf16>
    %80 = vector.shape_cast %79 : vector<1x4x256xbf16> to vector<4x256xbf16>
    %c4 = arith.constant 4 : index
    %c0_56 = arith.constant 0 : index
    %81 = vector.load %arg11[%c4, %c0_56] : memref<36x256xbf16, #tpu.memory_space<vmem>>, vector<4x256xbf16>
    tpu.vector_store %arg11[%c4, %c0_56], %80 {strides = array<i32>} : memref<36x256xbf16, #tpu.memory_space<vmem>>, vector<4x256xbf16>,
    %c0_57 = arith.constant 0 : index
    %c0_58 = arith.constant 0 : index
    %c1_59 = arith.constant 1 : index
    %82 = vector.load %arg10[%c0_57, %c0_58, %c1_59] : memref<4x4x384xbf16, #tpu.memory_space<vmem>>, vector<1x4x256xbf16>
    %83 = vector.shape_cast %82 : vector<1x4x256xbf16> to vector<4x256xbf16>
    %c8 = arith.constant 8 : index
    %c0_60 = arith.constant 0 : index
    %84 = vector.load %arg11[%c8, %c0_60] : memref<36x256xbf16, #tpu.memory_space<vmem>>, vector<4x256xbf16>
    tpu.vector_store %arg11[%c8, %c0_60], %83 {strides = array<i32>} : memref<36x256xbf16, #tpu.memory_space<vmem>>, vector<4x256xbf16>,
    %c2_61 = arith.constant 2 : index
    %c0_62 = arith.constant 0 : index
    %c0_63 = arith.constant 0 : index
    %85 = vector.load %arg10[%c2_61, %c0_62, %c0_63] : memref<4x4x384xbf16, #tpu.memory_space<vmem>>, vector<1x4x256xbf16>
    %86 = vector.shape_cast %85 : vector<1x4x256xbf16> to vector<4x256xbf16>
    %c12 = arith.constant 12 : index
    %c0_64 = arith.constant 0 : index
    %87 = vector.load %arg11[%c12, %c0_64] : memref<36x256xbf16, #tpu.memory_space<vmem>>, vector<4x256xbf16>
    tpu.vector_store %arg11[%c12, %c0_64], %86 {strides = array<i32>} : memref<36x256xbf16, #tpu.memory_space<vmem>>, vector<4x256xbf16>,
    %c3_65 = arith.constant 3 : index
    %c0_66 = arith.constant 0 : index
    %c0_67 = arith.constant 0 : index
    %88 = vector.load %arg10[%c3_65, %c0_66, %c0_67] : memref<4x4x384xbf16, #tpu.memory_space<vmem>>, vector<1x4x256xbf16>
    %89 = vector.shape_cast %88 : vector<1x4x256xbf16> to vector<4x256xbf16>
    %c16 = arith.constant 16 : index
    %c0_68 = arith.constant 0 : index
    %90 = vector.load %arg11[%c16, %c0_68] : memref<36x256xbf16, #tpu.memory_space<vmem>>, vector<4x256xbf16>
    tpu.vector_store %arg11[%c16, %c0_68], %89 {strides = array<i32>} : memref<36x256xbf16, #tpu.memory_space<vmem>>, vector<4x256xbf16>,
    %c2_69 = arith.constant 2 : index
    %c0_70 = arith.constant 0 : index
    %c1_71 = arith.constant 1 : index
    %91 = vector.load %arg10[%c2_69, %c0_70, %c1_71] : memref<4x4x384xbf16, #tpu.memory_space<vmem>>, vector<1x4x256xbf16>
    %92 = vector.shape_cast %91 : vector<1x4x256xbf16> to vector<4x256xbf16>
    %c20 = arith.constant 20 : index
    %c0_72 = arith.constant 0 : index
    %93 = vector.load %arg11[%c20, %c0_72] : memref<36x256xbf16, #tpu.memory_space<vmem>>, vector<4x256xbf16>
    tpu.vector_store %arg11[%c20, %c0_72], %92 {strides = array<i32>} : memref<36x256xbf16, #tpu.memory_space<vmem>>, vector<4x256xbf16>,
    %c0_73 = arith.constant 0 : index
    %c0_74 = arith.constant 0 : index
    %c9 = arith.constant 9 : index
    %94 = vector.load %arg10[%c0_73, %c0_74, %c9] : memref<4x4x384xbf16, #tpu.memory_space<vmem>>, vector<1x4x256xbf16>
    %95 = vector.shape_cast %94 : vector<1x4x256xbf16> to vector<4x256xbf16>
    %c24 = arith.constant 24 : index
    %c0_75 = arith.constant 0 : index
    %96 = vector.load %arg11[%c24, %c0_75] : memref<36x256xbf16, #tpu.memory_space<vmem>>, vector<4x256xbf16>
    tpu.vector_store %arg11[%c24, %c0_75], %95 {strides = array<i32>} : memref<36x256xbf16, #tpu.memory_space<vmem>>, vector<4x256xbf16>,
    %c1_76 = arith.constant 1 : index
    %c0_77 = arith.constant 0 : index
    %c9_78 = arith.constant 9 : index
    %97 = vector.load %arg10[%c1_76, %c0_77, %c9_78] : memref<4x4x384xbf16, #tpu.memory_space<vmem>>, vector<1x4x256xbf16>
    %98 = vector.shape_cast %97 : vector<1x4x256xbf16> to vector<4x256xbf16>
    %c28 = arith.constant 28 : index
    %c0_79 = arith.constant 0 : index
    %99 = vector.load %arg11[%c28, %c0_79] : memref<36x256xbf16, #tpu.memory_space<vmem>>, vector<4x256xbf16>
    tpu.vector_store %arg11[%c28, %c0_79], %98 {strides = array<i32>} : memref<36x256xbf16, #tpu.memory_space<vmem>>, vector<4x256xbf16>,
    %c0_80 = arith.constant 0 : index
    %c0_81 = arith.constant 0 : index
    %c10 = arith.constant 10 : index
    %100 = vector.load %arg10[%c0_80, %c0_81, %c10] : memref<4x4x384xbf16, #tpu.memory_space<vmem>>, vector<1x4x256xbf16>
    %101 = vector.shape_cast %100 : vector<1x4x256xbf16> to vector<4x256xbf16>
    %c32 = arith.constant 32 : index
    %c0_82 = arith.constant 0 : index
    %102 = vector.load %arg11[%c32, %c0_82] : memref<36x256xbf16, #tpu.memory_space<vmem>>, vector<4x256xbf16>
    tpu.vector_store %arg11[%c32, %c0_82], %101 {strides = array<i32>} : memref<36x256xbf16, #tpu.memory_space<vmem>>, vector<4x256xbf16>,
    %c0_83 = arith.constant 0 : index
    %c0_84 = arith.constant 0 : index
    %103 = vector.load %arg5[%c0_83, %c0_84] : memref<16x36xbf16, #tpu.memory_space<vmem>>, vector<16x36xbf16>
    %c0_85 = arith.constant 0 : index
    %c0_86 = arith.constant 0 : index
    %104 = vector.load %arg11[%c0_85, %c0_86] : memref<36x256xbf16, #tpu.memory_space<vmem>>, vector<36x256xbf16>
    %cst_87 = arith.constant dense<0.000000e+00> : vector<16x256xf32>
    %105 = tpu.matmul %103, %104, %cst_87 {dimension_numbers = #tpu.dot_dimension_numbers<[1], [0], [0], [1], [0, 0, 1, 1], [], []>} : vector<16x36xbf16>, vector<36x256xbf16>, vector<16x256xf32> -> vector<16x256xf32>
    %106 = vector.extract_strided_slice %105 {offsets = [0, 0], sizes = [8, 256], strides = [1, 1]} : vector<16x256xf32> to vector<8x256xf32>
    %107 = vector.extract_strided_slice %105 {offsets = [8, 0], sizes = [8, 256], strides = [1, 1]} : vector<16x256xf32> to vector<8x256xf32>
    %c4_88 = arith.constant 4 : index
    %c0_89 = arith.constant 0 : index
    %108 = vector.load %arg2[%c4_88, %c0_89] : memref<5x256xf32, #tpu.memory_space<vmem>>, vector<1x256xf32>
    %c0_90 = arith.constant 0 : index
    %c0_91 = arith.constant 0 : index
    %109 = vector.load %arg6[%c0_90, %c0_91] : memref<8x1xf32, #tpu.memory_space<vmem>>, vector<8x1xf32>
    %110 = vector.broadcast %109 : vector<8x1xf32> to vector<8x256xf32>
    %111 = arith.mulf %106, %110 : vector<8x256xf32>
    %c0_92 = arith.constant 0 : index
    %c0_93 = arith.constant 0 : index
    %112 = vector.load %arg7[%c0_92, %c0_93] : memref<8x1xf32, #tpu.memory_space<vmem>>, vector<8x1xf32>
    %113 = vector.broadcast %112 : vector<8x1xf32> to vector<8x256xf32>
    %114 = arith.addf %111, %113 : vector<8x256xf32>
    %cst_94 = arith.constant 0.000000e+00 : f32
    %115 = vector.broadcast %cst_94 : f32 to vector<8x256xf32>
    %116 = arith.maximumf %114, %115 : vector<8x256xf32>
    %117 = vector.broadcast %108 : vector<1x256xf32> to vector<8x256xf32>
    %118 = arith.mulf %116, %117 : vector<8x256xf32>
    %c0_95 = arith.constant 0 : index
    %c0_96 = arith.constant 0 : index
    %119 = vector.load %arg12[%c0_95, %c0_96] : memref<8x512xbf16, #tpu.memory_space<vmem>>, vector<8x128xbf16>
    tpu.vector_store %arg12[%c0_95, %c0_96], %3 {strides = array<i32>} : memref<8x512xbf16, #tpu.memory_space<vmem>>, vector<8x128xbf16>,
    %c0_97 = arith.constant 0 : index
    %c384 = arith.constant 384 : index
    %120 = vector.load %arg12[%c0_97, %c384] : memref<8x512xbf16, #tpu.memory_space<vmem>>, vector<8x128xbf16>
    tpu.vector_store %arg12[%c0_97, %c384], %3 {strides = array<i32>} : memref<8x512xbf16, #tpu.memory_space<vmem>>, vector<8x128xbf16>,
    %121 = arith.truncf %118 : vector<8x256xf32> to vector<8x256xbf16>
    %c0_98 = arith.constant 0 : index
    %c128 = arith.constant 128 : index
    %122 = vector.load %arg12[%c0_98, %c128] : memref<8x512xbf16, #tpu.memory_space<vmem>>, vector<8x256xbf16>
    tpu.vector_store %arg12[%c0_98, %c128], %121 {strides = array<i32>} : memref<8x512xbf16, #tpu.memory_space<vmem>>, vector<8x256xbf16>,
    %c0_99 = arith.constant 0 : index
    %c118 = arith.constant 118 : index
    %123 = vector.load %arg12[%c0_99, %c118] : memref<8x512xbf16, #tpu.memory_space<vmem>>, vector<8x256xbf16>
    %c0_100 = arith.constant 0 : index
    %c0_101 = arith.constant 0 : index
    %124 = vector.load %arg13[%c0_100, %c0_101] : memref<72x256xbf16, #tpu.memory_space<vmem>>, vector<8x256xbf16>
    tpu.vector_store %arg13[%c0_100, %c0_101], %123 {strides = array<i32>} : memref<72x256xbf16, #tpu.memory_space<vmem>>, vector<8x256xbf16>,
    %c0_102 = arith.constant 0 : index
    %c119 = arith.constant 119 : index
    %125 = vector.load %arg12[%c0_102, %c119] : memref<8x512xbf16, #tpu.memory_space<vmem>>, vector<8x256xbf16>
    %c8_103 = arith.constant 8 : index
    %c0_104 = arith.constant 0 : index
    %126 = vector.load %arg13[%c8_103, %c0_104] : memref<72x256xbf16, #tpu.memory_space<vmem>>, vector<8x256xbf16>
    tpu.vector_store %arg13[%c8_103, %c0_104], %125 {strides = array<i32>} : memref<72x256xbf16, #tpu.memory_space<vmem>>, vector<8x256xbf16>,
    %c0_105 = arith.constant 0 : index
    %c120 = arith.constant 120 : index
    %127 = vector.load %arg12[%c0_105, %c120] : memref<8x512xbf16, #tpu.memory_space<vmem>>, vector<8x256xbf16>
    %c16_106 = arith.constant 16 : index
    %c0_107 = arith.constant 0 : index
    %128 = vector.load %arg13[%c16_106, %c0_107] : memref<72x256xbf16, #tpu.memory_space<vmem>>, vector<8x256xbf16>
    tpu.vector_store %arg13[%c16_106, %c0_107], %127 {strides = array<i32>} : memref<72x256xbf16, #tpu.memory_space<vmem>>, vector<8x256xbf16>,
    %c0_108 = arith.constant 0 : index
    %c127 = arith.constant 127 : index
    %129 = vector.load %arg12[%c0_108, %c127] : memref<8x512xbf16, #tpu.memory_space<vmem>>, vector<8x256xbf16>
    %c24_109 = arith.constant 24 : index
    %c0_110 = arith.constant 0 : index
    %130 = vector.load %arg13[%c24_109, %c0_110] : memref<72x256xbf16, #tpu.memory_space<vmem>>, vector<8x256xbf16>
    tpu.vector_store %arg13[%c24_109, %c0_110], %129 {strides = array<i32>} : memref<72x256xbf16, #tpu.memory_space<vmem>>, vector<8x256xbf16>,
    %c0_111 = arith.constant 0 : index
    %c128_112 = arith.constant 128 : index
    %131 = vector.load %arg12[%c0_111, %c128_112] : memref<8x512xbf16, #tpu.memory_space<vmem>>, vector<8x256xbf16>
    %c32_113 = arith.constant 32 : index
    %c0_114 = arith.constant 0 : index
    %132 = vector.load %arg13[%c32_113, %c0_114] : memref<72x256xbf16, #tpu.memory_space<vmem>>, vector<8x256xbf16>
    tpu.vector_store %arg13[%c32_113, %c0_114], %131 {strides = array<i32>} : memref<72x256xbf16, #tpu.memory_space<vmem>>, vector<8x256xbf16>,
    %c0_115 = arith.constant 0 : index
    %c129 = arith.constant 129 : index
    %133 = vector.load %arg12[%c0_115, %c129] : memref<8x512xbf16, #tpu.memory_space<vmem>>, vector<8x256xbf16>
    %c40 = arith.constant 40 : index
    %c0_116 = arith.constant 0 : index
    %134 = vector.load %arg13[%c40, %c0_116] : memref<72x256xbf16, #tpu.memory_space<vmem>>, vector<8x256xbf16>
    tpu.vector_store %arg13[%c40, %c0_116], %133 {strides = array<i32>} : memref<72x256xbf16, #tpu.memory_space<vmem>>, vector<8x256xbf16>,
    %c0_117 = arith.constant 0 : index
    %c136 = arith.constant 136 : index
    %135 = vector.load %arg12[%c0_117, %c136] : memref<8x512xbf16, #tpu.memory_space<vmem>>, vector<8x256xbf16>
    %c48 = arith.constant 48 : index
    %c0_118 = arith.constant 0 : index
    %136 = vector.load %arg13[%c48, %c0_118] : memref<72x256xbf16, #tpu.memory_space<vmem>>, vector<8x256xbf16>
    tpu.vector_store %arg13[%c48, %c0_118], %135 {strides = array<i32>} : memref<72x256xbf16, #tpu.memory_space<vmem>>, vector<8x256xbf16>,
    %c0_119 = arith.constant 0 : index
    %c137 = arith.constant 137 : index
    %137 = vector.load %arg12[%c0_119, %c137] : memref<8x512xbf16, #tpu.memory_space<vmem>>, vector<8x256xbf16>
    %c56 = arith.constant 56 : index
    %c0_120 = arith.constant 0 : index
    %138 = vector.load %arg13[%c56, %c0_120] : memref<72x256xbf16, #tpu.memory_space<vmem>>, vector<8x256xbf16>
    tpu.vector_store %arg13[%c56, %c0_120], %137 {strides = array<i32>} : memref<72x256xbf16, #tpu.memory_space<vmem>>, vector<8x256xbf16>,
    %c0_121 = arith.constant 0 : index
    %c138 = arith.constant 138 : index
    %139 = vector.load %arg12[%c0_121, %c138] : memref<8x512xbf16, #tpu.memory_space<vmem>>, vector<8x256xbf16>
    %c64 = arith.constant 64 : index
    %c0_122 = arith.constant 0 : index
    %140 = vector.load %arg13[%c64, %c0_122] : memref<72x256xbf16, #tpu.memory_space<vmem>>, vector<8x256xbf16>
    tpu.vector_store %arg13[%c64, %c0_122], %139 {strides = array<i32>} : memref<72x256xbf16, #tpu.memory_space<vmem>>, vector<8x256xbf16>,
    %c0_123 = arith.constant 0 : index
    %c0_124 = arith.constant 0 : index
    %141 = vector.load %arg8[%c0_123, %c0_124] : memref<8x72xbf16, #tpu.memory_space<vmem>>, vector<8x72xbf16>
    %c0_125 = arith.constant 0 : index
    %c0_126 = arith.constant 0 : index
    %142 = vector.load %arg13[%c0_125, %c0_126] : memref<72x256xbf16, #tpu.memory_space<vmem>>, vector<72x256xbf16>
    %cst_127 = arith.constant dense<0.000000e+00> : vector<8x256xf32>
    %143 = tpu.matmul %141, %142, %cst_127 {dimension_numbers = #tpu.dot_dimension_numbers<[1], [0], [0], [1], [0, 0, 1, 1], [], []>} : vector<8x72xbf16>, vector<72x256xbf16>, vector<8x256xf32> -> vector<8x256xf32>
    %144 = arith.addf %143, %107 : vector<8x256xf32>
    %145 = arith.truncf %144 : vector<8x256xf32> to vector<8x256xbf16>
    %c0_128 = arith.constant 0 : index
    %c0_129 = arith.constant 0 : index
    %146 = vector.load %arg9[%c0_128, %c0_129] : memref<8x256xbf16, #tpu.memory_space<vmem>>, vector<8x256xbf16>
    tpu.vector_store %arg9[%c0_128, %c0_129], %145 {strides = array<i32>} : memref<8x256xbf16, #tpu.memory_space<vmem>>, vector<8x256xbf16>,
    return
  }
  func.func @transform_0(%arg0: i32) -> (i32, i32, i32) {
    %c0_i32 = arith.constant 0 : i32
    %c0_i32_0 = arith.constant 0 : i32
    %c0_i32_1 = arith.constant 0 : i32
    return %c0_i32, %c0_i32_0, %arg0 : i32, i32, i32
  }
  func.func @transform_1(%arg0: i32) -> (i32, i32) {
    %c0_i32 = arith.constant 0 : i32
    %c0_i32_0 = arith.constant 0 : i32
    %c0_i32_1 = arith.constant 0 : i32
    return %c0_i32, %c0_i32_0 : i32, i32
  }
  func.func @transform_2(%arg0: i32) -> (i32, i32) {
    %c0_i32 = arith.constant 0 : i32
    %c0_i32_0 = arith.constant 0 : i32
    %c0_i32_1 = arith.constant 0 : i32
    return %c0_i32, %c0_i32_0 : i32, i32
  }
  func.func @transform_3(%arg0: i32) -> (i32, i32) {
    %c0_i32 = arith.constant 0 : i32
    %c0_i32_0 = arith.constant 0 : i32
    %c0_i32_1 = arith.constant 0 : i32
    return %c0_i32, %c0_i32_0 : i32, i32
  }
  func.func @transform_4(%arg0: i32) -> (i32, i32) {
    %c0_i32 = arith.constant 0 : i32
    %c0_i32_0 = arith.constant 0 : i32
    %c0_i32_1 = arith.constant 0 : i32
    return %c0_i32, %c0_i32_0 : i32, i32
  }
  func.func @transform_5(%arg0: i32) -> (i32, i32) {
    %c0_i32 = arith.constant 0 : i32
    %c0_i32_0 = arith.constant 0 : i32
    %c0_i32_1 = arith.constant 0 : i32
    return %c0_i32, %c0_i32_0 : i32, i32
  }
  func.func @transform_6(%arg0: i32) -> (i32, i32) {
    %c0_i32 = arith.constant 0 : i32
    %c0_i32_0 = arith.constant 0 : i32
    %c0_i32_1 = arith.constant 0 : i32
    return %c0_i32, %c0_i32_0 : i32, i32
  }
  func.func @transform_7(%arg0: i32) -> (i32, i32) {
    %c0_i32 = arith.constant 0 : i32
    %c0_i32_0 = arith.constant 0 : i32
    %c0_i32_1 = arith.constant 0 : i32
    return %c0_i32, %c0_i32_0 : i32, i32
  }
  func.func @transform_8(%arg0: i32) -> (i32, i32) {
    %c0_i32 = arith.constant 0 : i32
    %c0_i32_0 = arith.constant 0 : i32
    return %c0_i32, %arg0 : i32, i32
  }
}

</mosaic_0001>

<bundles_post_ra>
// kernel: tpu_custom_call.1
= control target key start
LH: loop header
LB: loop body
LE: loop exit
PB: predicated region body
PF: predicated region fallthrough
CT: control target
= control target key end

     0   :  { %13 = vsyncpa [#allocation7], 0  ;;  %s1098_s0 = inlined_call_operand.hbm [shape: f32[4,4,256], index: 0, kind: input, shape index: {}]   ;;  %s1099_s1 = inlined_call_operand.vmem [shape: f32[5,256], index: 1, kind: input, shape index: {}]   ;;  %s1100_s2 = inlined_call_operand.vmem [shape: f32[4,1], index: 2, kind: input, shape index: {}]   ;;  %s1101_s3 = inlined_call_operand.vmem [shape: f32[4,1], index: 3, kind: input, shape index: {}]   ;;  %s1102_s4 = inlined_call_operand.vmem [shape: bf16[16,36], index: 4, kind: input, shape index: {}]   ;;  %s1103_s5 = inlined_call_operand.vmem [shape: f32[8,1], index: 5, kind: input, shape index: {}]   ;;  %s1104_s6 = inlined_call_operand.vmem [shape: f32[8,1], index: 6, kind: input, shape index: {}]   ;;  %s1105_s7 = inlined_call_operand.vmem [shape: bf16[8,72], index: 7, kind: input, shape index: {}]   ;;  %s1106_s8 = inlined_call_operand.hbm [shape: bf16[8,256], index: 8, kind: output, shape index: {}]  }
   0x1   :  { %14 = vsyncpa [#allocation8], 0  ;;  %s911_s27 = smov [#allocation6]   ;;  %s863_s9 = scalar_lea.hbm %s1098_s0, 512 }
   0x2   :  { %s20_s28 = sshll.u32 %s911_s27, 4  ;;  %p864_p0 = scmp.ne.s32.totalorder %s1098_s0, %s863_s9  ;;  %s21_s28 = int_to_ptr.vmem [resolvable:$true] %s20_s28 }
   0x3   :  { %p867_p1 = scmp.lt.u32.totalorder %s863_s9, %s1098_s0 }
   0x5   :  { %p869_p2 = pnand %p867_p1, %p864_p0 }
   0x7   :  { %872 = shalt.err (!%p869_p2)
}
   0x8   :  { %s873_s14 = scalar_lea.vmem %s21_s28, 512  ;;  %p878_p4 = scmp.lt.s32.totalorder %s21_s28, %s21_s28 }
   0x9   :  { %p874_p3 = scmp.ne.s32.totalorder %s21_s28, %s873_s14  ;;  %p879_p5 = scmp.lt.s32.totalorder %s873_s14, %s873_s14 }
   0xb   :  { %p880_p6 = por %p879_p5, %p878_p4 }
   0xd   :  { %p881_p7 = pnand %p880_p6, %p874_p3 }
   0xf   :  { %884 = shalt.err (!%p881_p7)
}
  0x10   :  { %s912_s15 = smov 128   ;;  %s913_s16 = smov 8  }
  0x11   :  { %26 = dma.hbm_to_vmem [thread:$0]  %s1098_s0, 512, %s21_s28, [#allocation7], %s912_s15, %s912_s15, %s913_s16  }
  0x12   :  { %907 = dma.done.wait [#allocation7], 512  }
  0x13   :  { %908 = vsyncadd [#allocation7], 4294966784  ;;  %v914_v0 = vmov 0   ;;  %v45_v1 = vld [vmem:[%s1100_s2] sm:$0xf]  ;;  %v55_v5 = vlaneseq  ;;  %v47_v17 = vld [vmem:[#allocation6] sm:$0xff] }
  0x14   :  { %845 = vset.pattern.permute.xlu0 %v914_v0  ;;  %105 = vst [vmem:[#allocation2 + $0x4] sm:$0x3] %v914_v0  ;;  %143 = vst [vmem:[#allocation2 + $0xa] sm:$0x3] %v914_v0  ;;  %485 = vmatprep.mubr.bf16.mxu0 %v914_v0  ;;  %v46_v2 = vld [vmem:[%s1101_s3] sm:$0xf] }
  0x15   :  { %181 = vst [vmem:[#allocation2 + $0x10] sm:$0x3] %v914_v0  ;;  %529 = vst [vmem:[#allocation4] sm:$0xf] %v914_v0  ;;  %846 = vset.pattern.permute.xlu1 %v914_v0  ;;  %757 = vmatprep.mubr.bf16.mxu1 %v914_v0  ;;  %v915_v3 = vmov 839922192  }
  0x16   :  { %530 = vst [vmem:[#allocation4 + $0xc] sm:$0xf] %v914_v0  ;;  %50 = vperm.xlu0 %845, %v45_v1   ;;  %v53_v4 = vunpack.c.l.s4 %v915_v3  ;;  %v56_v7 = vshrl.u32 %v55_v5, 7  ;;  %v75_v11 = vld [vmem:[%s1099_s1] ss:$8 sm:$0x3] }
  0x17   :  { %v792_v12 = vld [vmem:[%s1099_s1 + $0x1] ss:$8 sm:$0x3]  ;;  %v795_v13 = vld [vmem:[%s1099_s1 + $0x2] ss:$8 sm:$0x3] }
  0x18   :  { %v54_v6 = vunpack.c.0.s8 %v53_v4  ;;  %v989_v8 = vsub.s32 0, %v56_v7  ;;  %v991_v10 = vsub.s32 1, %v56_v7  ;;  %v798_v14 = vld [vmem:[%s1099_s1 + $0x3] ss:$8 sm:$0x3]  ;;  %v107_v22 = vld [vmem:[#allocation6 + $0x8] sm:$0xff] }
  0x19   :  { %v145_v23 = vld [vmem:[#allocation6 + $0x10] sm:$0xff]  ;;  %v183_v24 = vld [vmem:[#allocation6 + $0x18] sm:$0xff]  ;;  %v916_v51 = vmov 1983009808   ;;  %s917_s28 = smov 119   ;;  %s918_s29 = smov 127  }
  0x1a   :  { %63 = vperm.xlu0 %845, %v46_v2   ;;  %v57_v9 = vsub.s32 %v54_v6, %v56_v7  ;;  %v80_v16 = vrot.slane %v75_v11, %v989_v8  ;;  %v84_v19 = vrot.slane %v75_v11, %v991_v10  ;;  %v117_v20 = vrot.slane %v792_v12, %v989_v8  ;;  %s919_s30 = smov 118   ;;  %s922_s15 = smov 1  }
  0x1b   :  { %v121_v21 = vrot.slane %v792_v12, %v991_v10  ;;  %v155_v25 = vrot.slane %v795_v13, %v989_v8  ;;  %v159_v26 = vrot.slane %v795_v13, %v991_v10  ;;  %v193_v27 = vrot.slane %v798_v14, %v989_v8  ;;  %s923_s17 = smov 120   ;;  %s924_s19 = smov [#allocation9]  }
  0x1c   :  { %v197_v28 = vrot.slane %v798_v14, %v991_v10  ;;  %v85_v35 = vcombine.low %v80_v16, %v84_v19  ;;  %v247_v52 = vunpack.c.l.s4 %v916_v51  ;;  %vm266_vm0 = vcmask 1043456   ;;  %s781_s20 = sshll.u32 %s924_s19, 4  ;;  %s782_s20 = int_to_ptr.vmem [resolvable:$true] %s781_s20 }
  0x1d   :  { %v122_v36 = vcombine.low %v117_v20, %v121_v21  ;;  %v160_v37 = vcombine.low %v155_v25, %v159_v26  ;;  %v506_v26 = vld [vmem:[%s1104_s6] sm:$0xff]  ;;  %vm268_vm1 = vcmask 1039360   ;;  %vm346_vm2 = vcmask 973824   ;;  %s885_s21 = scalar_lea.vmem %s782_s20, 128  ;;  %p890_p9 = scmp.lt.s32.totalorder %s782_s20, %s782_s20 }
  0x1e   :  { %v198_v38 = vcombine.low %v193_v27, %v197_v28  ;;  %v248_v61 = vunpack.c.0.s8 %v247_v52  ;;  %vm401_vm3 = vcmask 965632   ;;  %vm446_vm4 = vcmask 1041408   ;;  %p886_p8 = scmp.ne.s32.totalorder %s782_s20, %s885_s21  ;;  %p891_p10 = scmp.lt.s32.totalorder %s885_s21, %s885_s21 }
  0x1f   :  { %vm442_vm5 = vcmask 293888   ;;  %vm551_vm6 = vcmask 80896   ;;  %vm566_vm7 = vcmask 72704   ;;  %vm581_vm8 = vcmask 64512  }
  0x20   :  { %v251_v62 = vsub.s32 %v248_v61, %v56_v7  ;;  %vm596_vm9 = vcmask 7168   ;;  %vm627_vm10 = vcmask 982016   ;;  %vm714_vm11 = vcmask 588800   ;;  %p892_p11 = por %p891_p10, %p890_p9 }
  0x22   :  { %p893_p12 = pnand %p892_p11, %p886_p8 }
  0x95   :  { %v51_v15 = vpop.permute.xlu0 %50 }
  0x96   :  { %v58_v18 = vrot.slane %v51_v15, %v57_v9 }
  0x98   :  { %v60_v29 = vmul.f32 %v58_v18, %v47_v17  ;;  %v108_v31 = vmul.f32 %v107_v22, %v58_v18  ;;  %v146_v32 = vmul.f32 %v145_v23, %v58_v18  ;;  %v184_v33 = vmul.f32 %v183_v24, %v58_v18  ;;  %v498_v22 = vld [vmem:[%s1103_s5] sm:$0xff] }
  0x99   :  { %v64_v30 = vpop.permute.xlu0 %63 }
  0x9a   :  { %v71_v34 = vrot.slane %v64_v30, %v57_v9 }
  0x9c   :  { %v73_v39 = vadd.f32 %v71_v34, %v60_v29  ;;  %v109_v40 = vadd.f32 %v108_v31, %v71_v34  ;;  %v147_v41 = vadd.f32 %v146_v32, %v71_v34  ;;  %v185_v42 = vadd.f32 %v184_v33, %v71_v34 }
  0x9e   :  { %v74_v43 = vmax.f32 %v73_v39, 0.0  ;;  %v110_v44 = vmax.f32 %v109_v40, 0.0  ;;  %v148_v45 = vmax.f32 %v147_v41, 0.0  ;;  %v186_v46 = vmax.f32 %v185_v42, 0.0 }
  0xa0   :  { %v87_v47 = vmul.f32 %v85_v35, %v74_v43  ;;  %v124_v48 = vmul.f32 %v122_v36, %v110_v44  ;;  %v162_v49 = vmul.f32 %v160_v37, %v148_v45  ;;  %v200_v50 = vmul.f32 %v198_v38, %v186_v46 }
  0xa2   :  { %v89_v53 = vcombine.high %v87_v47, %v87_v47  ;;  %v126_v54 = vcombine.high %v124_v48, %v124_v48  ;;  %v164_v55 = vcombine.high %v162_v49, %v162_v49  ;;  %v202_v56 = vcombine.high %v200_v50, %v200_v50 }
  0xa4   :  { %v790_v57 = vpack.c.bf16 %v89_v53, %v87_v47  ;;  %v793_v58 = vpack.c.bf16 %v126_v54, %v124_v48  ;;  %v796_v59 = vpack.c.bf16 %v164_v55, %v162_v49  ;;  %v799_v60 = vpack.c.bf16 %v202_v56, %v200_v50 }
  0xa6   :  { %791 = vst.sshfl [vmem:[#allocation2] sm:$0x33 pattern:$0x76325410] %v790_v57 }
  0xa7   :  { %794 = vst.sshfl [vmem:[#allocation2 + $0x6] sm:$0x33 pattern:$0x76325410] %v793_v58 }
  0xa8   :  { %797 = vst.sshfl [vmem:[#allocation2 + $0xc] sm:$0x33 pattern:$0x76325410] %v796_v59 }
  0xa9   :  { %800 = vst.sshfl [vmem:[#allocation2 + $0x12] sm:$0x33 pattern:$0x76325410] %v799_v60 }
  0xad   :  { %v322_v63 = vld [vmem:[#allocation2] sm:$0x3f] }
  0xae   :  { %v243_v0 = vld [vmem:[#allocation2] sm:$0x3f]  ;;  %v331_v2 = vrot.slane %v322_v63, %v251_v62  ;;  %v350_v5 = vld [vmem:[#allocation2 + $0x6] sm:$0x3f]  ;;  %v324_v21 = vcombine.high %v322_v63, %v322_v63 }
  0xaf   :  { %v295_v1 = vld [vmem:[#allocation2 + $0xc] sm:$0x3f]  ;;  %v252_v3 = vrot.slane %v243_v0, %v251_v62  ;;  %v801_v6 = vld.sshfl [vmem:[#allocation2] sm:$0x33 pattern:$0x76325410]  ;;  %v352_v14 = vcombine.low %v350_v5, %v350_v5  ;;  %v245_v15 = vcombine.high %v243_v0, %v243_v0  ;;  %v366_v17 = vrot.slane %v350_v5, %v251_v62 }
  0xb0   :  { %v297_v4 = vcombine.low %v295_v1, %v295_v1  ;;  %v852_v9 = vld [vmem:[#allocation2 + $0x6] ss:$0 sps:$4 sm:$0xff]   ;;  %339 = vrot.lane.b32.xlu0 %v331_v2, %s917_s28  ;;  %230 = vst [vmem:[#allocation3] sm:$0x33] %v801_v6  ;;  %v853_v11 = vld [vmem:[#allocation2 + $0xc] ss:$0 sps:$4 sm:$0xff]   ;;  %v311_v13 = vrot.slane %v295_v1, %v251_v62  ;;  %v338_v23 = vrot.slane %v324_v21, %v251_v62 }
  0xb1   :  { %260 = vrot.lane.b32.xlu1 %v252_v3, %s918_s29  ;;  %802 = vst.sshfl [vmem:[#allocation3] sm:$0xf0 pattern:$0x76325410] %v852_v9  ;;  %v359_v16 = vrot.slane %v352_v14, %v251_v62  ;;  %v377_v18 = vld [vmem:[#allocation2] sm:$0x3f]  ;;  %v259_v20 = vrot.slane %v245_v15, %v251_v62 }
  0xb2   :  { %v804_v12 = vld.sshfl [vmem:[#allocation2 + $0x12] sm:$0x33 pattern:$0x76325410]  ;;  %v304_v7 = vrot.slane %v297_v4, %v251_v62  ;;  %v386_v19 = vrot.slane %v377_v18, %v251_v62  ;;  %v379_v24 = vcombine.high %v377_v18, %v377_v18  ;;  %v862_v1 = vld [vmem:[%s1102_s4] sm:$0xff]   ;;  %s921_s4 = smov 9  }
  0xb3   :  { %803 = vst.sshfl [vmem:[#allocation3 + $0x8] sm:$0xf0 pattern:$0x76325410] %v853_v11  ;;  %294 = vst [vmem:[#allocation3 + $0x10] sm:$0x33] %v804_v12 }
  0xb4   :  { %312 = vrot.lane.b32.xlu0 %v304_v7, %s918_s29  ;;  %v393_v25 = vrot.slane %v379_v24, %v251_v62  ;;  %v603_v2 = vld [vmem:[#allocation4 + $0xc] sm:$0xf] }
  0xb5   :  { %314 = vrot.lane.b32.xlu1 %v311_v13, %s918_s29  ;;  %v814_v5 = vld [vmem:[%s1099_s1 + $0x4] ss:$8 sm:$0x3]  ;;  %s920_s1 = smov 10  }
  0xb6   :  { %v520_v13 = vrot.slane %v814_v5, %v989_v8 }
  0xb8   :  { %367 = vrot.lane.b32.xlu0 %v359_v16, %s917_s28  ;;  %v524_v16 = vrot.slane %v814_v5, %v991_v10 }
  0xb9   :  { %369 = vrot.lane.b32.xlu1 %v366_v17, %s917_s28 }
  0xbc   :  { %394 = vrot.lane.b32.xlu0 %v386_v19, %s919_s30 }
  0xbd   :  { %262 = vrot.lane.b32.xlu1 %v259_v20, %s918_s29 }
  0xc0   :  { %501 = vperm.xlu0 %845, %v498_v22  }
  0xc1   :  { %341 = vrot.lane.b32.xlu1 %v338_v23, %s917_s28 }
  0xc5   :  { %396 = vrot.lane.b32.xlu1 %v393_v25, %s919_s30 }
  0xc9   :  { %509 = vperm.xlu1 %846, %v506_v26   ;;  %v617_v26 = vld [vmem:[#allocation4 + $0xc] sm:$0xf] }
  0xcd   :  { %608 = vrot.lane.b32.xlu1 %v603_v2, %s918_s29 }
 0x122   :  { %v340_v27 = vpop.permute.xlu0 %339 }
 0x123   :  { %v261_v28 = vpop.permute.xlu1 %260  ;;  %v343_v47 = vrot.slane %v340_v27, 4 }
 0x124   :  { %v264_v42 = vrot.slane %v261_v28, 4 }
 0x126   :  { %v313_v29 = vpop.permute.xlu0 %312 }
 0x127   :  { %v315_v30 = vpop.permute.xlu1 %314  ;;  %v316_v31 = vrot.slane %v313_v29, 4 }
 0x128   :  { %v317_v32 = vrot.slane %v315_v30, 4 }
 0x12a   :  { %v318_v33 = vsel %vm266_vm0, %v316_v31, %v317_v32  ;;  %v368_v35 = vpop.permute.xlu0 %367 }
 0x12b   :  { %v319_v34 = vsel %vm268_vm1, %v313_v29, %v318_v33  ;;  %v370_v36 = vpop.permute.xlu1 %369  ;;  %v371_v37 = vrot.slane %v368_v35, 4 }
 0x12c   :  { %321 = vst [vmem:[#allocation3 + $0x10] sm:$0xcc] %v319_v34  ;;  %v372_v38 = vrot.slane %v370_v36, 4 }
 0x12e   :  { %v373_v39 = vsel %vm266_vm0, %v371_v37, %v372_v38  ;;  %v395_v49 = vpop.permute.xlu0 %394 }
 0x12f   :  { %v374_v40 = vsel %vm346_vm2, %v368_v35, %v373_v39  ;;  %v263_v41 = vpop.permute.xlu1 %262  ;;  %v398_v53 = vrot.slane %v395_v49, 4 }
 0x130   :  { %376 = vst [vmem:[#allocation3 + $0x18] sm:$0xcc] %v374_v40  ;;  %v265_v43 = vrot.slane %v263_v41, 4 }
 0x132   :  { %v267_v44 = vsel %vm266_vm0, %v264_v42, %v265_v43 }
 0x133   :  { %v269_v45 = vsel %vm268_vm1, %v261_v28, %v267_v44  ;;  %v342_v46 = vpop.permute.xlu1 %341  ;;  %v646_v28 = vld [vmem:[#allocation4 + $0xc] sm:$0xf] }
 0x134   :  { %271 = vst [vmem:[#allocation3 + $0x8] sm:$0x33] %v269_v45  ;;  %v344_v48 = vrot.slane %v342_v46, 4 }
 0x136   :  { %v345_v50 = vsel %vm266_vm0, %v343_v47, %v344_v48 }
 0x137   :  { %v347_v51 = vsel %vm346_vm2, %v340_v27, %v345_v50  ;;  %v397_v52 = vpop.permute.xlu1 %396  ;;  %v632_v27 = vld [vmem:[#allocation4 + $0xc] sm:$0xf] }
 0x138   :  { %349 = vst [vmem:[#allocation3 + $0x18] sm:$0x33] %v347_v51  ;;  %v399_v54 = vrot.slane %v397_v52, 4 }
 0x13a   :  { %v400_v55 = vsel %vm266_vm0, %v398_v53, %v399_v54 }
 0x13b   :  { %v402_v56 = vsel %vm401_vm3, %v395_v49, %v400_v55  ;;  %v854_v57 = vld [vmem:[#allocation3 + $0x4] ss:$8 sps:$4 sm:$0xff]   ;;  %v856_v58 = vld [vmem:[#allocation3] ss:$8 sps:$4 sm:$0xff]  }
 0x13c   :  { %404 = vst [vmem:[#allocation3 + $0x20] sm:$0x33] %v402_v56  ;;  %453 = vmatprep.subr.bf16.mxu0 %v854_v57 }
 0x13d   :  { %454 = vmatpush1.bf16.msra.mxu0 %v856_v58 }
 0x13f   :  { %v857_v59 = vld [vmem:[#allocation3 + $0x14] ss:$8 sps:$4 sm:$0xff]   ;;  %v859_v60 = vld [vmem:[#allocation3 + $0x10] ss:$8 sps:$4 sm:$0xff]   ;;  %v502_v3 = vpop.permute.xlu0 %501 }
 0x140   :  { %455 = vmatprep.subr.bf16.mxu0 %v857_v59 }
 0x141   :  { %456 = vmatpush1.bf16.msra.mxu0 %v859_v60 }
 0x143   :  { %v411_v61 = vld [vmem:[#allocation3 + $0x20] sm:$0x33] }
 0x144   :  { %v811_v62 = vcombine.high %v411_v61, %v411_v61  ;;  %v810_v63 = vcombine.low %v411_v61, %v411_v61 }
 0x146   :  { %812 = vmatprep.subr.msk.bf16.mxu0 %vm446_vm4, %v811_v62  ;;  %v448_v0 = vsel %vm446_vm4, %v810_v63, 0 }
 0x147   :  { %458 = vmatpush1.bf16.msra.mxu0 %v448_v0 }
 0x148   :  { %v510_v6 = vpop.permute.xlu1 %509 }
 0x14a   :  { %813 = vmatmul.mubr.msk.bf16.vlgmr.msra.gmra.mrb[0].mxu0 %vm442_vm5, %v862_v1 }
 0x14c   :  { %v609_v29 = vpop.permute.xlu1 %608 }
 0x14d   :  { %v611_v58 = vrot.slane %v609_v29, 4 }
 0x21d   :  { %v487_v4 = vpop.f32.mrb[0].mxu0 }
 0x21e   :  { %v504_v9 = vmul.f32 %v502_v3, %v487_v4  ;;  %v489_v11 = vpop.f32.mrb[1].mxu0 }
 0x21f   :  { %v505_v12 = vmul.f32 %v502_v3, %v489_v11  ;;  %v1046_v7 = vpop.f32.mrb[2].mxu0 }
 0x220   :  { %v512_v14 = vadd.f32 %v510_v6, %v504_v9  ;;  %v1049_v15 = vpop.f32.mrb[3].mxu0 }
 0x221   :  { %v513_v17 = vadd.f32 %v510_v6, %v505_v12 }
 0x222   :  { %v514_v18 = vmax.f32 %v512_v14, 0.0 }
 0x223   :  { %v515_v19 = vmax.f32 %v513_v17, 0.0 }
 0x224   :  { %v527_v20 = vmul.f32 %v520_v13, %v514_v18 }
 0x225   :  { %v528_v21 = vmul.f32 %v524_v16, %v515_v19 }
 0x227   :  { %v1052_v22 = vpack.c.bf16 %v528_v21, %v527_v20 }
 0x229   :  { %539 = vst [vmem:[#allocation4 + $0x4] sm:$0xff] %v1052_v22 }
 0x230   :  { %v541_v23 = vld [vmem:[#allocation4 + $0x8] sm:$0xf]  ;;  %v540_v24 = vld [vmem:[#allocation4] sm:$0xff] }
 0x231   :  { %546 = vrot.lane.b32.xlu1 %v541_v23, %s920_s1  ;;  %544 = vrot.lane.b32.xlu0 %v540_v24, %s920_s1  ;;  %v556_v8 = vld [vmem:[#allocation4 + $0x8] sm:$0xf] }
 0x232   :  { %v571_v25 = vld [vmem:[#allocation4 + $0x8] sm:$0xf] }
 0x233   :  { %v586_v10 = vld [vmem:[#allocation4 + $0x8] sm:$0xf] }
 0x235   :  { %561 = vrot.lane.b32.xlu1 %v556_v8, %s921_s4  ;;  %559 = vrot.lane.b32.xlu0 %v540_v24, %s921_s4 }
 0x239   :  { %576 = vrot.lane.b32.xlu1 %v571_v25, %s913_s16  ;;  %574 = vrot.lane.b32.xlu0 %v540_v24, %s913_s16 }
 0x23d   :  { %591 = vrot.lane.b32.xlu1 %v586_v10, %s922_s15  ;;  %589 = vrot.lane.b32.xlu0 %v540_v24, %s922_s15 }
 0x241   :  { %606 = vrot.lane.b32.xlu0 %v1052_v22, %s918_s29  ;;  %622 = vrot.lane.b32.xlu1 %v617_v26, %s923_s17  ;;  %v659_v26 = vld [vmem:[%s1105_s7] sm:$0xf] }
 0x245   :  { %620 = vrot.lane.b32.xlu0 %v1052_v22, %s923_s17  ;;  %637 = vrot.lane.b32.xlu1 %v632_v27, %s917_s28 }
 0x249   :  { %635 = vrot.lane.b32.xlu0 %v1052_v22, %s917_s28  ;;  %651 = vrot.lane.b32.xlu1 %v646_v28, %s919_s30 }
 0x24d   :  { %649 = vrot.lane.b32.xlu0 %v1052_v22, %s919_s30 }
 0x2a3   :  { %v547_v30 = vpop.permute.xlu1 %546  ;;  %v545_v31 = vpop.permute.xlu0 %544 }
 0x2a4   :  { %v549_v32 = vrot.slane %v547_v30, 4  ;;  %v548_v33 = vrot.slane %v545_v31, 4 }
 0x2a6   :  { %v550_v38 = vsel %vm266_vm0, %v548_v33, %v549_v32 }
 0x2a7   :  { %v562_v34 = vpop.permute.xlu1 %561  ;;  %v560_v35 = vpop.permute.xlu0 %559  ;;  %v552_v42 = vsel %vm551_vm6, %v545_v31, %v550_v38 }
 0x2a8   :  { %v564_v36 = vrot.slane %v562_v34, 4  ;;  %v563_v37 = vrot.slane %v560_v35, 4 }
 0x2aa   :  { %v565_v39 = vsel %vm266_vm0, %v563_v37, %v564_v36 }
 0x2ab   :  { %v577_v40 = vpop.permute.xlu1 %576  ;;  %v575_v41 = vpop.permute.xlu0 %574  ;;  %v567_v43 = vsel %vm566_vm7, %v560_v35, %v565_v39 }
 0x2ac   :  { %v579_v44 = vrot.slane %v577_v40, 4  ;;  %v578_v45 = vrot.slane %v575_v41, 4  ;;  %v817_v46 = vcombine.high %v552_v42, %v567_v43  ;;  %v816_v47 = vcombine.low %v552_v42, %v567_v43 }
 0x2ae   :  { %725 = vmatprep.subr.bf16.mxu1 %v817_v46  ;;  %v580_v50 = vsel %vm266_vm0, %v578_v45, %v579_v44 }
 0x2af   :  { %v592_v48 = vpop.permute.xlu1 %591  ;;  %726 = vmatpush1.bf16.msra.mxu1 %v816_v47  ;;  %v590_v49 = vpop.permute.xlu0 %589  ;;  %v582_v54 = vsel %vm581_vm8, %v575_v41, %v580_v50 }
 0x2b0   :  { %v594_v51 = vrot.slane %v592_v48, 4  ;;  %v593_v52 = vrot.slane %v590_v49, 4 }
 0x2b2   :  { %v595_v53 = vsel %vm266_vm0, %v593_v52, %v594_v51 }
 0x2b3   :  { %v597_v55 = vsel %vm596_vm9, %v590_v49, %v595_v53  ;;  %v607_v56 = vpop.permute.xlu0 %606  ;;  %v623_v57 = vpop.permute.xlu1 %622 }
 0x2b4   :  { %v818_v59 = vcombine.low %v582_v54, %v597_v55  ;;  %v819_v60 = vcombine.high %v582_v54, %v597_v55  ;;  %v610_v61 = vrot.slane %v607_v56, 4  ;;  %v625_v4 = vrot.slane %v623_v57, 4 }
 0x2b6   :  { %v612_v62 = vsel %vm266_vm0, %v610_v61, %v611_v58  ;;  %727 = vmatprep.subr.bf16.mxu1 %v819_v60 }
 0x2b7   :  { %v613_v63 = vsel %vm268_vm1, %v607_v56, %v612_v62  ;;  %728 = vmatpush1.bf16.msra.mxu1 %v818_v59  ;;  %v621_v0 = vpop.permute.xlu0 %620  ;;  %v638_v1 = vpop.permute.xlu1 %637 }
 0x2b8   :  { %v820_v2 = vcombine.low %v1052_v22, %v613_v63  ;;  %v821_v3 = vcombine.high %v1052_v22, %v613_v63  ;;  %v624_v5 = vrot.slane %v621_v0, 4  ;;  %v640_v6 = vrot.slane %v638_v1, 4 }
 0x2ba   :  { %729 = vmatprep.subr.bf16.mxu1 %v821_v3  ;;  %v626_v12 = vsel %vm266_vm0, %v624_v5, %v625_v4 }
 0x2bb   :  { %730 = vmatpush1.bf16.msra.mxu1 %v820_v2  ;;  %v636_v9 = vpop.permute.xlu0 %635  ;;  %v652_v11 = vpop.permute.xlu1 %651  ;;  %v628_v17 = vsel %vm627_vm10, %v621_v0, %v626_v12 }
 0x2bc   :  { %v639_v13 = vrot.slane %v636_v9, 4  ;;  %v654_v16 = vrot.slane %v652_v11, 4 }
 0x2be   :  { %v641_v14 = vsel %vm266_vm0, %v639_v13, %v640_v6 }
 0x2bf   :  { %v642_v18 = vsel %vm346_vm2, %v636_v9, %v641_v14  ;;  %v650_v19 = vpop.permute.xlu0 %649 }
 0x2c0   :  { %v822_v20 = vcombine.low %v628_v17, %v642_v18  ;;  %v823_v21 = vcombine.high %v628_v17, %v642_v18  ;;  %v653_v22 = vrot.slane %v650_v19, 4 }
 0x2c2   :  { %v655_v23 = vsel %vm266_vm0, %v653_v22, %v654_v16  ;;  %731 = vmatprep.subr.bf16.mxu1 %v823_v21 }
 0x2c3   :  { %v656_v24 = vsel %vm401_vm3, %v650_v19, %v655_v23  ;;  %732 = vmatpush1.bf16.msra.mxu1 %v822_v20 }
 0x2c4   :  { %v824_v8 = vcombine.low %v656_v24, %v656_v24  ;;  %v825_v25 = vcombine.high %v656_v24, %v656_v24 }
 0x2c6   :  { %826 = vmatprep.subr.msk.bf16.mxu1 %vm266_vm0, %v825_v25  ;;  %v720_v10 = vsel %vm266_vm0, %v824_v8, 0 }
 0x2c7   :  { %734 = vmatpush1.bf16.msra.mxu1 %v720_v10 }
 0x2ca   :  { %827 = vmatmul.mubr.msk.bf16.vlgmr.msra.gmra.mrb[0].mxu1 %vm714_vm11, %v659_v26 }
 0x39d   :  { %v759_v27 = vpop.f32.mrb[0].mxu1 }
 0x39e   :  { %v760_v28 = vadd.f32 %v759_v27, %v1046_v7  ;;  %v761_v29 = vpop.f32.mrb[1].mxu1 }
 0x39f   :  { %v762_v30 = vadd.f32 %v761_v29, %v1049_v15  ;;  %v763_v31 = vpop.f32.mrb[2].mxu1 }
 0x3a0   :  { %v764_v32 = vpop.f32.mrb[3].mxu1 }
 0x3a1   :  { %v830_v33 = vpack.c.bf16 %v762_v30, %v760_v28 }
 0x3a3   :  { %774 = vst [vmem:[#allocation9] sm:$0xff] %v830_v33 }
 0x3a4   :  { %896 = shalt.err (!%p893_p12)
}
 0x3a5   :  { %s897_s0 = scalar_lea.hbm %s1106_s8, 128 }
 0x3a6   :  { %p898_p13 = scmp.ne.s32.totalorder %s1106_s8, %s897_s0  ;;  %p901_p0 = scmp.lt.u32.totalorder %s897_s0, %s1106_s8 }
 0x3a8   :  { %p903_p1 = pnand %p901_p0, %p898_p13 }
 0x3aa   :  { %906 = shalt.err (!%p903_p1)
}
 0x3ab   :  { %784 = dma.vmem_to_hbm [thread:$0]  %s782_s20, 128, %s1106_s8, [#allocation8]  }
 0x3ac   :  { %909 = dma.done.wait [#allocation8], 128  }
 0x3ad   :  { %910 = vsyncadd [#allocation8], 4294967168 }
 0x3ae   :  { %788 = vsyncpa [#allocation7], 1 }
 0x3af   :  { %789 = vsyncpa [#allocation8], 1 }

</bundles_post_ra>
